<compile_context>
chip_gen: v7x
topology: tpu7x:2x2x1
jax: 0.10.0
libtpu: 0.0.40
codegen_flags: <defaults>
</compile_context>

<pallas_src>
import jax
import jax.numpy as jnp
from jax.experimental import pallas as pl
from jax.experimental.pallas import tpu as pltpu


def _round_up(a: int, m: int) -> int:
    return ((a + m - 1) // m) * m


def _project_logits_kernel(x_ref, w_ref, b_ref, logits_ref, lse_ref,
                           m_ref, l_ref):
    # x_ref:      (tm, d_model)        input rows (resident across j)
    # w_ref:      (d_model, tv)        streamed weight tile
    # b_ref:      (n_vocab_tiles, tv)  resident f32 bias table
    # logits_ref: (tm, tv)             OUTPUT: raw biased logits tile
    # lse_ref:    (tm, 1) f32          OUTPUT: per-row logsumexp (last j only)
    # m_ref/l_ref:(tm, 1) f32          running max / running sum-of-exp
    j = pl.program_id(1)
    nj = pl.num_programs(1)

    @pl.when(j == 0)
    def _init():
        m_ref[...] = jnp.full_like(m_ref, -jnp.inf)
        l_ref[...] = jnp.zeros_like(l_ref)

    # MXU matmul in the native input dtype, f32 accumulation.
    logits = jnp.dot(x_ref[...], w_ref[...], preferred_element_type=jnp.float32)
    logits = logits + b_ref[pl.ds(j, 1), :]             # (tm, tv) + (1, tv)

    # Stream this vocab tile of raw (biased) logits straight out; the
    # log_softmax shift is applied in a cheap fused pass outside the kernel.
    logits_ref[...] = logits.astype(logits_ref.dtype)

    # Online logsumexp across vocab tiles.
    m_prev = m_ref[...]
    m_new = jnp.maximum(m_prev, jnp.max(logits, axis=-1, keepdims=True))
    l_ref[...] = (l_ref[...] * jnp.exp(m_prev - m_new)
                  + jnp.sum(jnp.exp(logits - m_new), axis=-1, keepdims=True))
    m_ref[...] = m_new

    @pl.when(j == nj - 1)
    def _finalize():
        lse_ref[...] = m_ref[...] + jnp.log(l_ref[...])


def _vmem_budget_bytes() -> int:
    """~75% of per-core VMEM (headroom for compiler scratch), capped at 100 MiB."""
    cap = 64 * 1024 * 1024
    try:
        cap = int(pltpu.get_tpu_info().vmem_capacity_bytes)
    except Exception:
        pass
    return min(int(cap * 0.75), 100 * 1024 * 1024)


def project_layer(x, w, b, *, tm=512, tv=1024, compute_dtype=None):
    """ProjectLayer forward: log_softmax(x @ w + b, axis=-1).

    x: [B, S, d_model], w: [d_model, vocab], b: [vocab] -> [B, S, vocab].
    compute_dtype: optionally cast x/w (e.g. bf16) for the matmul; accumulation
    stays f32 and the output keeps the original x dtype.
    """
    B, S, d_model = x.shape
    vocab = w.shape[1]
    M = B * S
    out_dtype = x.dtype

    if compute_dtype is not None:
        x = x.astype(compute_dtype)
        w = w.astype(compute_dtype)

    in_bytes = jnp.dtype(x.dtype).itemsize
    store_bytes = jnp.dtype(out_dtype).itemsize

    # ---- Tile sizing -------------------------------------------------------
    M8 = _round_up(M, 8)
    V128 = _round_up(vocab, 128)
    tm = _round_up(min(tm, M8), 8)
    tv = _round_up(min(tv, V128), 128)

    # Keep both v7x TensorCores busy on the "parallel" row axis when there is
    # enough row work for two blocks.
    if M8 >= 2 * 128 and M8 <= tm:
        tm = _round_up((M8 + 1) // 2, 8)

    budget = _vmem_budget_bytes()

    def vmem_est(tm_, tv_):
        return (2 * tm_ * d_model * in_bytes       # x block (double-buffered)
                + 2 * d_model * tv_ * in_bytes     # weight tile (double-buffered)
                + 2 * tm_ * tv_ * store_bytes      # logits output tile
                + 2 * V128 * 4                     # resident f32 bias
                + 8 * tm_ * 4)                     # lse output + m/l scratch

    while vmem_est(tm, tv) > budget and tv > 128:
        tv = _round_up(tv // 2, 128)
    while vmem_est(tm, tv) > budget and tm > 8:
        tm = _round_up(tm // 2, 8)

    M_pad = _round_up(M, tm)
    V_pad = _round_up(vocab, tv)
    nj = V_pad // tv

    # ---- Host-side padding / layout ----------------------------------------
    x2 = x.reshape(M, d_model)
    if M_pad != M:
        x2 = jnp.pad(x2, ((0, M_pad - M), (0, 0)))
    w_p = w if V_pad == vocab else jnp.pad(w, ((0, 0), (0, V_pad - vocab)))
    # Bias: f32; padded columns get -1e30 so exp() underflows to 0 in the
    # logsumexp; one row per vocab tile, kept VMEM-resident in the kernel.
    b_p = b.astype(jnp.float32)
    if V_pad != vocab:
        b_p = jnp.pad(b_p, (0, V_pad - vocab), constant_values=-1e30)
    b_tiles = b_p.reshape(nj, tv)

    cost = pl.CostEstimate(
        flops=2 * M_pad * d_model * V_pad,
        transcendentals=M_pad * V_pad,
        bytes_accessed=(x2.size * in_bytes
                        + (M_pad // tm) * w_p.size * in_bytes  # weight re-streamed per row block
                        + b_tiles.size * 4
                        + M_pad * V_pad * store_bytes
                        + M_pad * 4),
    )

    logits_raw, lse = pl.pallas_call(
        _project_logits_kernel,
        out_shape=(
            jax.ShapeDtypeStruct((M_pad, V_pad), out_dtype),
            jax.ShapeDtypeStruct((M_pad, 1), jnp.float32),
        ),
        grid_spec=pltpu.PrefetchScalarGridSpec(
            num_scalar_prefetch=0,
            grid=(M_pad // tm, nj),
            in_specs=[
                pl.BlockSpec((tm, d_model), lambda i, j: (i, 0)),  # x rows
                pl.BlockSpec((d_model, tv), lambda i, j: (0, j)),  # weight tile
                pl.BlockSpec((nj, tv), lambda i, j: (0, 0)),       # resident bias
            ],
            out_specs=[
                pl.BlockSpec((tm, tv), lambda i, j: (i, j)),       # logits tile
                pl.BlockSpec((tm, 1), lambda i, j: (i, 0)),        # per-row lse
            ],
            scratch_shapes=[
                pltpu.VMEM((tm, 1), jnp.float32),                  # running max
                pltpu.VMEM((tm, 1), jnp.float32),                  # running sum-of-exp
            ],
        ),
        compiler_params=pltpu.CompilerParams(
            dimension_semantics=("parallel", "arbitrary"),
            vmem_limit_bytes=budget,
        ),
        cost_estimate=cost,
    )(x2, w_p, b_tiles)

    # Cheap fused correction pass: unpad slice + broadcast-subtract (XLA fuses
    # this into a single elementwise pass over the valid M x vocab region).
    out = (logits_raw[:M, :vocab] - lse[:M]).astype(out_dtype)
    return out.reshape(B, S, vocab)


if __name__ == "__main__":
    # Shapes consistent with the module's forward:
    # batch=2, seq=8, d_model=32, vocab_size=128
    B, S, d_model, vocab_size = 2, 8, 32, 128

    key = jax.random.PRNGKey(0)
    kx, kw, kb = jax.random.split(key, 3)

    x = jax.random.normal(kx, (B, S, d_model), dtype=jnp.float32)
    bound = 1.0 / (d_model ** 0.5)
    w = jax.random.uniform(kw, (d_model, vocab_size), jnp.float32, -bound, bound)
    b = jax.random.uniform(kb, (vocab_size,), jnp.float32, -bound, bound)

    out = jax.block_until_ready(project_layer(x, w, b))
    ref = jax.nn.log_softmax(x @ w + b, axis=-1)
    assert out.shape == (B, S, vocab_size)
    assert jnp.allclose(out, ref, atol=1e-5, rtol=1e-5)

    # Second check: non-divisible row count + non-multiple-of-128 vocab with
    # several vocab tiles -> exercises row/vocab padding, the resident bias
    # table, the per-tile output streaming, and the online logsumexp.
    B2, S2, d2, v2 = 2, 5, 32, 300
    k1, k2, k3 = jax.random.split(jax.random.PRNGKey(1), 3)
    x_b = jax.random.normal(k1, (B2, S2, d2), dtype=jnp.float32)
    w_b = jax.random.uniform(k2, (d2, v2), jnp.float32, -bound, bound)
    b_b = jax.random.uniform(k3, (v2,), jnp.float32, -bound, bound)
    out_b = jax.block_until_ready(project_layer(x_b, w_b, b_b, tv=128))
    ref_b = jax.nn.log_softmax(x_b @ w_b + b_b, axis=-1)
    assert out_b.shape == (B2, S2, v2)
    assert jnp.allclose(out_b, ref_b, atol=1e-5, rtol=1e-5)

    print("KERNEL_OK")
</pallas_src>

<mosaic_0001>
module attributes {stable_mosaic.version = 11 : i64} {
  func.func @_project_logits_kernel(%arg0: i32, %arg1: i32, %arg2: memref<16x32xf32, #tpu.memory_space<vmem>>, %arg3: memref<32x128xf32, #tpu.memory_space<vmem>>, %arg4: memref<1x128xf32, #tpu.memory_space<vmem>>, %arg5: memref<16x128xf32, #tpu.memory_space<vmem>>, %arg6: memref<16x1xf32, #tpu.memory_space<vmem>>, %arg7: memref<16x1xf32, #tpu.memory_space<vmem>>, %arg8: memref<16x1xf32, #tpu.memory_space<vmem>>) attributes {dimension_semantics = [#tpu.dimension_semantics<parallel>, #tpu.dimension_semantics<arbitrary>], iteration_bounds = array<i64: 1, 1>, scalar_prefetch = 0 : i64, scratch_operands = 2 : i64, tpu.core_type = #tpu.core_type<tc>, window_params = [{transform_indices = @transform_0, window_bounds = array<i64: 16, 32>}, {transform_indices = @transform_1, window_bounds = array<i64: 32, 128>}, {pipeline_mode = #tpu.pipeline_mode<synchronous>, transform_indices = @transform_2, window_bounds = array<i64: 1, 128>}, {transform_indices = @transform_3, window_bounds = array<i64: 16, 128>}, {transform_indices = @transform_4, window_bounds = array<i64: 16, 1>}]} {
    %c0_i32 = arith.constant 0 : i32
    %0 = arith.cmpi eq, %arg1, %c0_i32 : i32
    %1 = arith.extui %0 : i1 to i32
    %c0_i32_0 = arith.constant 0 : i32
    %2 = arith.cmpi ne, %1, %c0_i32_0 : i32
    scf.if %2 {
      %cst_19 = arith.constant 0xFF800000 : f32
      %30 = vector.broadcast %cst_19 : f32 to vector<16x1xf32>
      %c0_20 = arith.constant 0 : index
      %c0_21 = arith.constant 0 : index
      %31 = vector.load %arg7[%c0_20, %c0_21] : memref<16x1xf32, #tpu.memory_space<vmem>>, vector<16x1xf32>
      tpu.vector_store %arg7[%c0_20, %c0_21], %30 {strides = array<i32>} : memref<16x1xf32, #tpu.memory_space<vmem>>, vector<16x1xf32>,
      %cst_22 = arith.constant 0.000000e+00 : f32
      %32 = vector.broadcast %cst_22 : f32 to vector<16x1xf32>
      %c0_23 = arith.constant 0 : index
      %c0_24 = arith.constant 0 : index
      %33 = vector.load %arg8[%c0_23, %c0_24] : memref<16x1xf32, #tpu.memory_space<vmem>>, vector<16x1xf32>
      tpu.vector_store %arg8[%c0_23, %c0_24], %32 {strides = array<i32>} : memref<16x1xf32, #tpu.memory_space<vmem>>, vector<16x1xf32>,
    } else {
    }
    %c0 = arith.constant 0 : index
    %c0_1 = arith.constant 0 : index
    %3 = vector.load %arg2[%c0, %c0_1] : memref<16x32xf32, #tpu.memory_space<vmem>>, vector<16x32xf32>
    %c0_2 = arith.constant 0 : index
    %c0_3 = arith.constant 0 : index
    %4 = vector.load %arg3[%c0_2, %c0_3] : memref<32x128xf32, #tpu.memory_space<vmem>>, vector<32x128xf32>
    %cst = arith.constant dense<0.000000e+00> : vector<16x128xf32>
    %5 = tpu.matmul %3, %4, %cst {dimension_numbers = #tpu.dot_dimension_numbers<[1], [0], [0], [1], [0, 0, 1, 1], [], []>} : vector<16x32xf32>, vector<32x128xf32>, vector<16x128xf32> -> vector<16x128xf32>
    %6 = arith.index_cast %arg1 : i32 to index
    %c0_4 = arith.constant 0 : index
    %7 = vector.load %arg4[%6, %c0_4] : memref<1x128xf32, #tpu.memory_space<vmem>>, vector<1x128xf32>
    %8 = vector.broadcast %7 : vector<1x128xf32> to vector<16x128xf32>
    %9 = arith.addf %5, %8 : vector<16x128xf32>
    %c0_5 = arith.constant 0 : index
    %c0_6 = arith.constant 0 : index
    %10 = vector.load %arg5[%c0_5, %c0_6] : memref<16x128xf32, #tpu.memory_space<vmem>>, vector<16x128xf32>
    tpu.vector_store %arg5[%c0_5, %c0_6], %9 {strides = array<i32>} : memref<16x128xf32, #tpu.memory_space<vmem>>, vector<16x128xf32>,
    %c0_7 = arith.constant 0 : index
    %c0_8 = arith.constant 0 : index
    %11 = vector.load %arg7[%c0_7, %c0_8] : memref<16x1xf32, #tpu.memory_space<vmem>>, vector<16x1xf32>
    %cst_9 = arith.constant dense<0xFF800000> : vector<16xf32>
    %12 = vector.multi_reduction <maximumf>, %9, %cst_9 [1] : vector<16x128xf32> to vector<16xf32>
    %13 = vector.shape_cast %12 : vector<16xf32> to vector<16x1xf32>
    %14 = arith.maximumf %11, %13 : vector<16x1xf32>
    %c0_10 = arith.constant 0 : index
    %c0_11 = arith.constant 0 : index
    %15 = vector.load %arg8[%c0_10, %c0_11] : memref<16x1xf32, #tpu.memory_space<vmem>>, vector<16x1xf32>
    %16 = arith.subf %11, %14 : vector<16x1xf32>
    %17 = math.exp %16 : vector<16x1xf32>
    %18 = arith.mulf %15, %17 : vector<16x1xf32>
    %19 = vector.broadcast %14 : vector<16x1xf32> to vector<16x128xf32>
    %20 = arith.subf %9, %19 : vector<16x128xf32>
    %21 = math.exp %20 : vector<16x128xf32>
    %cst_12 = arith.constant dense<0.000000e+00> : vector<16xf32>
    %22 = vector.multi_reduction <add>, %21, %cst_12 [1] : vector<16x128xf32> to vector<16xf32>
    %23 = vector.shape_cast %22 : vector<16xf32> to vector<16x1xf32>
    %24 = arith.addf %18, %23 : vector<16x1xf32>
    %c0_13 = arith.constant 0 : index
    %c0_14 = arith.constant 0 : index
    %25 = vector.load %arg8[%c0_13, %c0_14] : memref<16x1xf32, #tpu.memory_space<vmem>>, vector<16x1xf32>
    tpu.vector_store %arg8[%c0_13, %c0_14], %24 {strides = array<i32>} : memref<16x1xf32, #tpu.memory_space<vmem>>, vector<16x1xf32>,
    %c0_15 = arith.constant 0 : index
    %c0_16 = arith.constant 0 : index
    %26 = vector.load %arg7[%c0_15, %c0_16] : memref<16x1xf32, #tpu.memory_space<vmem>>, vector<16x1xf32>
    tpu.vector_store %arg7[%c0_15, %c0_16], %14 {strides = array<i32>} : memref<16x1xf32, #tpu.memory_space<vmem>>, vector<16x1xf32>,
    %c0_i32_17 = arith.constant 0 : i32
    %27 = arith.cmpi eq, %arg1, %c0_i32_17 : i32
    %28 = arith.extui %27 : i1 to i32
    %c0_i32_18 = arith.constant 0 : i32
    %29 = arith.cmpi ne, %28, %c0_i32_18 : i32
    scf.if %29 {
      %c0_19 = arith.constant 0 : index
      %c0_20 = arith.constant 0 : index
      %30 = vector.load %arg7[%c0_19, %c0_20] : memref<16x1xf32, #tpu.memory_space<vmem>>, vector<16x1xf32>
      %c0_21 = arith.constant 0 : index
      %c0_22 = arith.constant 0 : index
      %31 = vector.load %arg8[%c0_21, %c0_22] : memref<16x1xf32, #tpu.memory_space<vmem>>, vector<16x1xf32>
      %32 = math.log %31 : vector<16x1xf32>
      %33 = arith.addf %30, %32 : vector<16x1xf32>
      %c0_23 = arith.constant 0 : index
      %c0_24 = arith.constant 0 : index
      %34 = vector.load %arg6[%c0_23, %c0_24] : memref<16x1xf32, #tpu.memory_space<vmem>>, vector<16x1xf32>
      tpu.vector_store %arg6[%c0_23, %c0_24], %33 {strides = array<i32>} : memref<16x1xf32, #tpu.memory_space<vmem>>, vector<16x1xf32>,
    } else {
    }
    return
  }
  func.func @transform_0(%arg0: i32, %arg1: i32) -> (i32, i32) {
    %c0_i32 = arith.constant 0 : i32
    %c0_i32_0 = arith.constant 0 : i32
    return %arg0, %c0_i32 : i32, i32
  }
  func.func @transform_1(%arg0: i32, %arg1: i32) -> (i32, i32) {
    %c0_i32 = arith.constant 0 : i32
    %c0_i32_0 = arith.constant 0 : i32
    return %c0_i32, %arg1 : i32, i32
  }
  func.func @transform_2(%arg0: i32, %arg1: i32) -> (i32, i32) {
    %c0_i32 = arith.constant 0 : i32
    %c0_i32_0 = arith.constant 0 : i32
    %c0_i32_1 = arith.constant 0 : i32
    return %c0_i32, %c0_i32_0 : i32, i32
  }
  func.func @transform_3(%arg0: i32, %arg1: i32) -> (i32, i32) {
    %c0_i32 = arith.constant 0 : i32
    return %arg0, %arg1 : i32, i32
  }
  func.func @transform_4(%arg0: i32, %arg1: i32) -> (i32, i32) {
    %c0_i32 = arith.constant 0 : i32
    %c0_i32_0 = arith.constant 0 : i32
    return %arg0, %c0_i32 : i32, i32
  }
}

</mosaic_0001>

<bundles_post_ra>
// kernel: tpu_custom_call.1
= control target key start
LH: loop header
LB: loop body
LE: loop exit
PB: predicated region body
PF: predicated region fallthrough
CT: control target
= control target key end

     0   :  { %10 = vsyncpa [#allocation5], 0  ;;  %s452_s0 = inlined_call_operand.hbm [shape: f32[16,32], index: 0, kind: input, shape index: {}]   ;;  %s453_s1 = inlined_call_operand.hbm [shape: f32[32,128], index: 1, kind: input, shape index: {}]   ;;  %s454_s2 = inlined_call_operand.vmem [shape: f32[1,128], index: 2, kind: input, shape index: {}]   ;;  %s455_s3 = inlined_call_operand.hbm [shape: f32[16,128], index: 3, kind: output, shape index: {0}]   ;;  %s456_s4 = inlined_call_operand.vmem [shape: f32[16,1], index: 4, kind: output, shape index: {1}]  }
   0x1   :  { %11 = vsyncpa [#allocation8], 0 }
   0x2   :  { %12 = vsyncpa [#allocation6], 0  ;;  %s355_s15 = smov [#allocation4]   ;;  %s283_s19 = scalar_lea.hbm %s452_s0, 256 }
   0x3   :  { %s18_s16 = sshll.u32 %s355_s15, 4  ;;  %p284_p0 = scmp.ne.s32.totalorder %s452_s0, %s283_s19  ;;  %s19_s16 = int_to_ptr.vmem [resolvable:$true] %s18_s16 }
   0x4   :  { %p287_p1 = scmp.lt.u32.totalorder %s283_s19, %s452_s0 }
   0x6   :  { %p289_p2 = pnand %p287_p1, %p284_p0 }
   0x8   :  { %292 = shalt.err (!%p289_p2)
}
   0x9   :  { %s293_s24 = scalar_lea.vmem %s19_s16, 256  ;;  %p298_p4 = scmp.lt.s32.totalorder %s19_s16, %s19_s16 }
   0xa   :  { %p294_p3 = scmp.ne.s32.totalorder %s19_s16, %s293_s24  ;;  %p299_p5 = scmp.lt.s32.totalorder %s293_s24, %s293_s24 }
   0xc   :  { %p300_p6 = por %p299_p5, %p298_p4 }
   0xe   :  { %p301_p7 = pnand %p300_p6, %p294_p3 }
  0x10   :  { %304 = shalt.err (!%p301_p7)
}
  0x11   :  { %s356_s25 = smov 128   ;;  %s357_s26 = smov 8  }
  0x12   :  { %24 = dma.hbm_to_vmem [thread:$0]  %s452_s0, 256, %s19_s16, [#allocation5], %s356_s25, %s356_s25, %s357_s26  }
  0x13   :  { %s358_s29 = smov [#allocation7]   ;;  %s305_s7 = scalar_lea.hbm %s453_s1, 512 }
  0x14   :  { %s30_s30 = sshll.u32 %s358_s29, 4  ;;  %p306_p8 = scmp.ne.s32.totalorder %s453_s1, %s305_s7  ;;  %s31_s30 = int_to_ptr.vmem [resolvable:$true] %s30_s30 }
  0x15   :  { %p309_p9 = scmp.lt.u32.totalorder %s305_s7, %s453_s1 }
  0x17   :  { %p311_p10 = pnand %p309_p9, %p306_p8 }
  0x19   :  { %314 = shalt.err (!%p311_p10)
}
  0x1a   :  { %s315_s12 = scalar_lea.vmem %s31_s30, 512  ;;  %p320_p12 = scmp.lt.s32.totalorder %s31_s30, %s31_s30 }
  0x1b   :  { %p316_p11 = scmp.ne.s32.totalorder %s31_s30, %s315_s12  ;;  %p321_p13 = scmp.lt.s32.totalorder %s315_s12, %s315_s12 }
  0x1d   :  { %p322_p0 = por %p321_p13, %p320_p12 }
  0x1f   :  { %p323_p1 = pnand %p322_p0, %p316_p11 }
  0x21   :  { %326 = shalt.err (!%p323_p1)
}
  0x22   :  { %36 = dma.hbm_to_vmem [thread:$0]  %s453_s1, 512, %s31_s30, [#allocation8], %s356_s25, %s356_s25, %s357_s26  }
  0x23   :  { %349 = dma.done.wait [#allocation5], 256  }
  0x24   :  { %350 = vsyncadd [#allocation5], 4294967040 }
  0x25   :  { %351 = dma.done.wait [#allocation8], 512  }
  0x26   :  { %352 = vsyncadd [#allocation8], 4294966784  ;;  %vm67_vm0 = vcmask 261120   ;;  %v56_v0 = vld [vmem:[#allocation7] sm:$0xff]  ;;  %v57_v1 = vld [vmem:[#allocation7 + $0x8] sm:$0xff]  ;;  %vm49_vm1 = vcmask 7168  }
  0x27   :  { %v58_v2 = vld [vmem:[#allocation7 + $0x10] sm:$0xff]  ;;  %v253_v3 = vpack.c.bf16 %v57_v1, %v56_v0  ;;  %v59_v4 = vld [vmem:[#allocation7 + $0x18] sm:$0xff]  ;;  %v359_v8 = vmov -inf   ;;  %v360_v14 = vmov 0   ;;  %v361_v15 = vmov 0.0  }
  0x28   :  { %v54_v5 = vld [vmem:[#allocation4] sm:$0xff]  ;;  %v257_v6 = vpack.c.bf16 %v59_v4, %v58_v2  ;;  %v55_v7 = vld [vmem:[#allocation4 + $0x8] sm:$0xff]  ;;  %50 = vst.msk [vmem:[#allocation2] sm:$0xff] %vm49_vm1, %v359_v8  ;;  %51 = vst.msk [vmem:[#allocation2 + $0x8] sm:$0xff] %vm49_vm1, %v359_v8  ;;  %269 = vset.pattern.permute.xlu1 %v360_v14  ;;  %270 = vset.pattern.permute.xlu0 %v360_v14 }
  0x29   :  { %250 = vmatprep.mubr.msk.f32.mxu0 %vm67_vm0, %v54_v5  ;;  %254 = vmatprep.subr.bf16.mxu0 %v253_v3  ;;  %v233_v9 = vld [vmem:[%s454_s2] ss:$0 sm:$0xff]  ;;  %52 = vst.msk [vmem:[#allocation3] sm:$0xff] %vm49_vm1, %v361_v15  ;;  %53 = vst.msk [vmem:[#allocation3 + $0x8] sm:$0xff] %vm49_vm1, %v361_v15  ;;  %s362_s2 = smov [#allocation9]  }
  0x2a   :  { %256 = vmatpush3.bf16.msra.mxu0 %v253_v3  ;;  %s216_s15 = sshll.u32 %s362_s2, 4  ;;  %s217_s15 = int_to_ptr.vmem [resolvable:$true] %s216_s15 }
  0x2b   :  { %258 = vmatprep.subr.bf16.mxu0 %v257_v6  ;;  %s327_s16 = scalar_lea.vmem %s217_s15, 256  ;;  %p332_p3 = scmp.lt.s32.totalorder %s217_s15, %s217_s15 }
  0x2c   :  { %p328_p2 = scmp.ne.s32.totalorder %s217_s15, %s327_s16  ;;  %p333_p4 = scmp.lt.s32.totalorder %s327_s16, %s327_s16 }
  0x2e   :  { %260 = vmatpush3.bf16.msra.mxu0 %v257_v6  ;;  %p334_p5 = por %p333_p4, %p332_p3 }
  0x2f   :  { %v151_v16 = vld [vmem:[#allocation2] sm:$0xff]  ;;  %v152_v19 = vld [vmem:[#allocation2 + $0x8] sm:$0xff] }
  0x30   :  { %p335_p6 = pnand %p334_p5, %p328_p2 }
  0x31   :  { %251 = vmatmul.mubr.msk.f32.vlgmr.msra.gmra.mrb[0].mxu0 %vm67_vm0, %v55_v7 }
 0x104   :  { %v252_v10 = vpop.f32.mrb[0].mxu0 }
 0x105   :  { %v146_v11 = vadd.f32 %v252_v10, %v233_v9  ;;  %v140_v12 = vpop.f32.mrb[1].mxu0 }
 0x106   :  { %v141_v13 = vadd.f32 %v233_v9, %v140_v12 }
 0x107   :  { %150 = vst [vmem:[#allocation9 + $0x8] sm:$0xff] %v146_v11 }
 0x108   :  { %149 = vst [vmem:[#allocation9] sm:$0xff] %v141_v13  ;;  %153 = vmax.xlane.f32.xlu0 %v141_v13 }
 0x10c   :  { %155 = vmax.xlane.f32.xlu0 %v146_v11 }
 0x195   :  { %v154_v17 = vpop.xlane.xlu0 %153 }
 0x196   :  { %v157_v18 = vmax.f32 %v151_v16, %v154_v17 }
 0x198   :  { %v161_v20 = vsub.f32 %v151_v16, %v157_v18  ;;  %194 = vst.msk [vmem:[#allocation2] sm:$0xff] %vm49_vm1, %v157_v18  ;;  %171 = vperm.xlu1 %269, %v157_v18  }
 0x199   :  { %v156_v21 = vpop.xlane.xlu0 %155 }
 0x19a   :  { %v158_v22 = vmax.f32 %v152_v19, %v156_v21 }
 0x19c   :  { %v162_v23 = vsub.f32 %v152_v19, %v158_v22  ;;  %195 = vst.msk [vmem:[#allocation2 + $0x8] sm:$0xff] %vm49_vm1, %v158_v22  ;;  %176 = vperm.xlu1 %269, %v158_v22  }
 0x217   :  { %v172_v24 = vpop.permute.xlu1 %171 }
 0x218   :  { %v179_v25 = vsub.f32 %v141_v13, %v172_v24 }
 0x21a   :  { %v181_v26 = vmul.f32 1.442695, %v179_v25 }
 0x21b   :  { %v177_v27 = vpop.permute.xlu1 %176 }
 0x21c   :  { %271 = vpow2.f32 %v181_v26  ;;  %v180_v28 = vsub.f32 %v146_v11, %v177_v27 }
 0x21e   :  { %v183_v29 = vmul.f32 1.442695, %v180_v28 }
 0x220   :  { %273 = vpow2.f32 %v183_v29 }
 0x226   :  { %v272_v30 = vpop.eup %271 }
 0x227   :  { %185 = vadd.xlane.f32.xlu0 %v272_v30 }
 0x22a   :  { %v274_v31 = vpop.eup %273 }
 0x22b   :  { %187 = vadd.xlane.f32.xlu1 %v274_v31 }
 0x22c   :  { %338 = shalt.err (!%p335_p6)
}
 0x22d   :  { %s339_s19 = scalar_lea.hbm %s455_s3, 256 }
 0x22e   :  { %p340_p7 = scmp.ne.s32.totalorder %s455_s3, %s339_s19  ;;  %p343_p8 = scmp.lt.u32.totalorder %s339_s19, %s455_s3 }
 0x230   :  { %p345_p9 = pnand %p343_p8, %p340_p7 }
 0x232   :  { %348 = shalt.err (!%p345_p9)
}
 0x233   :  { %222 = dma.vmem_to_hbm [thread:$0]  %s217_s15, 256, %s455_s3, [#allocation6], %s356_s25, %s356_s25, %s357_s26   ;;  %v163_v32 = vmul.f32 1.442695, %v161_v20  ;;  %v165_v33 = vmul.f32 1.442695, %v162_v23 }
 0x234   :  { %v159_v35 = vld [vmem:[#allocation3] sm:$0xff]  ;;  %v160_v39 = vld [vmem:[#allocation3 + $0x8] sm:$0xff]  ;;  %v199_v48 = vld [vmem:[#allocation2] sm:$0xff] }
 0x235   :  { %275 = vpow2.f32 %v163_v32  ;;  %v200_v52 = vld [vmem:[#allocation2 + $0x8] sm:$0xff] }
 0x236   :  { %277 = vpow2.f32 %v165_v33 }
 0x23f   :  { %v276_v34 = vpop.eup %275 }
 0x240   :  { %v167_v36 = vmul.f32 %v276_v34, %v159_v35  ;;  %v278_v37 = vpop.eup %277 }
 0x241   :  { %v168_v41 = vmul.f32 %v278_v37, %v160_v39 }
 0x2b4   :  { %v186_v38 = vpop.xlane.xlu0 %185 }
 0x2b5   :  { %v189_v40 = vadd.f32 %v186_v38, %v167_v36 }
 0x2b7   :  { %192 = vst.msk [vmem:[#allocation3] sm:$0xff] %vm49_vm1, %v189_v40 }
 0x2b8   :  { %v188_v42 = vpop.xlane.xlu1 %187 }
 0x2b9   :  { %v190_v43 = vadd.f32 %v188_v42, %v168_v41 }
 0x2bb   :  { %193 = vst.msk [vmem:[#allocation3 + $0x8] sm:$0xff] %vm49_vm1, %v190_v43 }
 0x2be   :  { %v201_v44 = vld [vmem:[#allocation3] sm:$0xff] }
 0x2bf   :  { %279 = vlog2.f32 %v201_v44 }
 0x2c2   :  { %v202_v45 = vld [vmem:[#allocation3 + $0x8] sm:$0xff] }
 0x2c3   :  { %281 = vlog2.f32 %v202_v45 }
 0x2c9   :  { %v280_v46 = vpop.eup %279 }
 0x2ca   :  { %v204_v47 = vmul.f32 0.6931472, %v280_v46 }
 0x2cc   :  { %v207_v49 = vadd.f32 %v204_v47, %v199_v48 }
 0x2cd   :  { %v282_v50 = vpop.eup %281 }
 0x2ce   :  { %209 = vst.msk [vmem:[%s456_s4] sm:$0xff] %vm49_vm1, %v207_v49  ;;  %v206_v51 = vmul.f32 0.6931472, %v282_v50 }
 0x2d0   :  { %v208_v53 = vadd.f32 %v206_v51, %v200_v52 }
 0x2d2   :  { %210 = vst.msk [vmem:[%s456_s4 + $0x8] sm:$0xff] %vm49_vm1, %v208_v53 }
 0x2d3   :  { %353 = dma.done.wait [#allocation6], 256  }
 0x2d4   :  { %354 = vsyncadd [#allocation6], 4294967040 }
 0x2d5   :  { %230 = vsyncpa [#allocation5], 1 }
 0x2d6   :  { %231 = vsyncpa [#allocation8], 1 }
 0x2d7   :  { %232 = vsyncpa [#allocation6], 1 }

</bundles_post_ra>
